<compile_context>
chip_gen: v7x
topology: tpu7x:2x2x1
jax: 0.10.0
libtpu: 0.0.40
codegen_flags: <defaults>
</compile_context>

<pallas_src>
import functools
import math

import jax
import jax.numpy as jnp
from jax.experimental import pallas as pl
from jax.experimental.pallas import tpu as pltpu

LANE = 128


# ----------------------------- Pallas kernel -------------------------------

def _sgc_kernel(adj_ref, x_ref, wt_ref, b_ref, o_ref, *, hops):
    """Fused SGC forward, linear-first: out = A_hat^K (x @ W^T) + b (VMEM-resident)."""
    adj = adj_ref[...]                                      # bf16, hoisted out of hop loop
    # Linear first (c_out-wide, lane-dense thanks to padding), f32 accumulate.
    h = jnp.dot(x_ref[...], wt_ref[...], preferred_element_type=jnp.float32)
    for _ in range(hops):                                   # static unroll, hops is tiny
        h = jnp.dot(adj, h.astype(adj.dtype), preferred_element_type=jnp.float32)
    # Bias added exactly once, after the last hop.  Lane-dense [N, 128] store.
    o_ref[...] = (h + b_ref[...]).astype(o_ref.dtype)


def sgc_forward(x, adj, w_t, b, *, hops):
    """x:[N,Cin]  adj:[N,N] (normalized)  w_t:[Cin,Cout] (pre-transposed)  b:[Cout]."""
    n, c_in = x.shape
    c_out = w_t.shape[1]
    c_pad = max(LANE, ((c_out + LANE - 1) // LANE) * LANE)

    # Lane-dense output: zero-pad W^T columns and bias up to a multiple of 128.
    wt_pad = jnp.zeros((c_in, c_pad), jnp.float32).at[:, :c_out].set(w_t)
    b_pad = jnp.zeros((1, c_pad), jnp.float32).at[0, :c_out].set(b)

    # bf16 MXU operands, f32 accumulation inside the kernel.
    adj_bf = adj.astype(jnp.bfloat16)
    x_bf = x.astype(jnp.bfloat16)
    wt_bf = wt_pad.astype(jnp.bfloat16)

    def vmem():
        return pl.BlockSpec(memory_space=pltpu.MemorySpace.VMEM)

    flops = 2 * n * c_in * c_pad + hops * 2 * n * n * c_pad
    bytes_accessed = (2 * (adj_bf.size + x_bf.size + wt_bf.size)
                      + 4 * b_pad.size + 4 * n * c_pad)

    out_pad = pl.pallas_call(
        functools.partial(_sgc_kernel, hops=hops),
        out_shape=jax.ShapeDtypeStruct((n, c_pad), jnp.float32),
        in_specs=[vmem(), vmem(), vmem(), vmem()],
        out_specs=vmem(),
        cost_estimate=pl.CostEstimate(
            flops=flops, transcendentals=0, bytes_accessed=bytes_accessed),
    )(adj_bf, x_bf, wt_bf, b_pad)

    return out_pad[:, :c_out]


# ------------------------------ JAX glue ------------------------------------

def gcn_norm_dense(edge_index, n):
    """Dense gcn_norm: D^{-1/2} (A + I) D^{-1/2}, message direction src->dst."""
    # M[dst, src] = 1 for each edge, so propagation is M @ x (out[i] = sum_j w_ji x_j).
    A = jnp.zeros((n, n), jnp.float32).at[edge_index[1], edge_index[0]].set(1.0)
    A = A + jnp.eye(n, dtype=jnp.float32)
    deg = A.sum(axis=1)                                    # in-degree incl. self-loop
    dinv = jnp.where(deg > 0.0, 1.0 / jnp.sqrt(deg), 0.0)
    return dinv[:, None] * A * dinv[None, :]


def init_linear(key, in_c, out_c):
    """PyTorch nn.Linear default init; returns (W^T [in,out], b [out])."""
    k1, k2 = jax.random.split(key)
    bound = 1.0 / math.sqrt(in_c)
    w = jax.random.uniform(k1, (out_c, in_c), jnp.float32, -bound, bound)
    b = jax.random.uniform(k2, (out_c,), jnp.float32, -bound, bound)
    return w.T, b                                          # pre-transpose once at init


# --------------------------------- main -------------------------------------

if __name__ == "__main__":
    n_nodes, in_c, out_c, hops = 64, 16, 8, 2

    key = jax.random.PRNGKey(0)
    kx, kw = jax.random.split(key)

    # deterministic node features
    x = jax.random.normal(kx, (n_nodes, in_c), jnp.float32)

    # deterministic undirected ring graph (both edge directions present)
    src = jnp.arange(n_nodes, dtype=jnp.int32)
    dst = (src + 1) % n_nodes
    edge_index = jnp.stack(
        [jnp.concatenate([src, dst]), jnp.concatenate([dst, src])], axis=0)
    adj = gcn_norm_dense(edge_index, n_nodes)

    # SGConv's single Linear layer
    w_t, b = init_linear(kw, in_c, out_c)

    out = sgc_forward(x, adj, w_t, b, hops=hops)
    out = jax.block_until_ready(out)

    # pure-JAX f32 reference for correctness (propagate-then-linear form)
    h_ref = x
    for _ in range(hops):
        h_ref = adj @ h_ref
    ref = h_ref @ w_t + b

    assert out.shape == (n_nodes, out_c), out.shape
    assert bool(jnp.all(jnp.isfinite(out)))
    # bf16 MXU operands -> loosen tolerance vs the f32 reference.
    assert bool(jnp.allclose(out, ref, rtol=2e-2, atol=2e-2)), (
        float(jnp.max(jnp.abs(out - ref))))
    print("KERNEL_OK")
</pallas_src>

<mosaic_0001>
module attributes {stable_mosaic.version = 11 : i64} {
  func.func @_sgc_kernel(%arg0: memref<64x64xbf16, #tpu.memory_space<vmem>>, %arg1: memref<64x16xbf16, #tpu.memory_space<vmem>>, %arg2: memref<16x128xbf16, #tpu.memory_space<vmem>>, %arg3: memref<1x128xf32, #tpu.memory_space<vmem>>, %arg4: memref<64x128xf32, #tpu.memory_space<vmem>>) attributes {dimension_semantics = [], scalar_prefetch = 0 : i64, scratch_operands = 0 : i64, tpu.core_type = #tpu.core_type<tc>} {
    %c0 = arith.constant 0 : index
    %c0_0 = arith.constant 0 : index
    %0 = vector.load %arg0[%c0, %c0_0] : memref<64x64xbf16, #tpu.memory_space<vmem>>, vector<64x64xbf16>
    %c0_1 = arith.constant 0 : index
    %c0_2 = arith.constant 0 : index
    %1 = vector.load %arg1[%c0_1, %c0_2] : memref<64x16xbf16, #tpu.memory_space<vmem>>, vector<64x16xbf16>
    %c0_3 = arith.constant 0 : index
    %c0_4 = arith.constant 0 : index
    %2 = vector.load %arg2[%c0_3, %c0_4] : memref<16x128xbf16, #tpu.memory_space<vmem>>, vector<16x128xbf16>
    %cst = arith.constant dense<0.000000e+00> : vector<64x128xf32>
    %3 = tpu.matmul %1, %2, %cst {dimension_numbers = #tpu.dot_dimension_numbers<[1], [0], [0], [1], [0, 0, 1, 1], [], []>} : vector<64x16xbf16>, vector<16x128xbf16>, vector<64x128xf32> -> vector<64x128xf32>
    %4 = arith.truncf %3 : vector<64x128xf32> to vector<64x128xbf16>
    %cst_5 = arith.constant dense<0.000000e+00> : vector<64x128xf32>
    %5 = tpu.matmul %0, %4, %cst_5 {dimension_numbers = #tpu.dot_dimension_numbers<[1], [0], [0], [1], [0, 0, 1, 1], [], []>} : vector<64x64xbf16>, vector<64x128xbf16>, vector<64x128xf32> -> vector<64x128xf32>
    %6 = arith.truncf %5 : vector<64x128xf32> to vector<64x128xbf16>
    %cst_6 = arith.constant dense<0.000000e+00> : vector<64x128xf32>
    %7 = tpu.matmul %0, %6, %cst_6 {dimension_numbers = #tpu.dot_dimension_numbers<[1], [0], [0], [1], [0, 0, 1, 1], [], []>} : vector<64x64xbf16>, vector<64x128xbf16>, vector<64x128xf32> -> vector<64x128xf32>
    %c0_7 = arith.constant 0 : index
    %c0_8 = arith.constant 0 : index
    %8 = vector.load %arg3[%c0_7, %c0_8] : memref<1x128xf32, #tpu.memory_space<vmem>>, vector<1x128xf32>
    %9 = vector.broadcast %8 : vector<1x128xf32> to vector<64x128xf32>
    %10 = arith.addf %7, %9 : vector<64x128xf32>
    %c0_9 = arith.constant 0 : index
    %c0_10 = arith.constant 0 : index
    %11 = vector.load %arg4[%c0_9, %c0_10] : memref<64x128xf32, #tpu.memory_space<vmem>>, vector<64x128xf32>
    tpu.vector_store %arg4[%c0_9, %c0_10], %10 {strides = array<i32>} : memref<64x128xf32, #tpu.memory_space<vmem>>, vector<64x128xf32>,
    return
  }
}

</mosaic_0001>

<bundles_post_ra>
// kernel: tpu_custom_call.1
= control target key start
LH: loop header
LB: loop body
LE: loop exit
PB: predicated region body
PF: predicated region fallthrough
CT: control target
= control target key end

     0   :  { %vm63_vm0 = vcmask 130048   ;;  %s542_s0 = inlined_call_operand.vmem [shape: bf16[64,64], index: 0, kind: input, shape index: {}]   ;;  %s543_s1 = inlined_call_operand.vmem [shape: bf16[64,16], index: 1, kind: input, shape index: {}]   ;;  %s544_s2 = inlined_call_operand.vmem [shape: bf16[16,128], index: 2, kind: input, shape index: {}]   ;;  %s545_s3 = inlined_call_operand.vmem [shape: f32[1,128], index: 3, kind: input, shape index: {}]   ;;  %s546_s4 = inlined_call_operand.hbm [shape: f32[64,128], index: 4, kind: output, shape index: {}]  }
   0x1   :  { %v431_v0 = vld [vmem:[%s544_s2] sm:$0xff]   ;;  %v433_v2 = vld [vmem:[%s543_s1 + $0x8] sm:$0xff]   ;;  %v434_v3 = vld [vmem:[%s543_s1 + $0x10] sm:$0xff]  }
   0x2   :  { %v432_v1 = vld [vmem:[%s543_s1] sm:$0xff]   ;;  %386 = vmatprep.subr.bf16.mxu0 %v431_v0 }
   0x3   :  { %387 = vmatpush3.bf16.msra.mxu0 %v431_v0  ;;  %388 = vmatprep.mubr.msk.bf16.mxu0 %vm63_vm0, %v432_v1 }
   0x6   :  { %389 = vmatmul.mubr.msk.bf16.vlgmr.msra.gmra.mrb[0].mxu0 %vm63_vm0, %v433_v2 }
   0x7   :  { %392 = vmatprep.mubr.msk.bf16.mxu0 %vm63_vm0, %v434_v3 }
   0x8   :  { %9 = vsyncpa [#allocation3], 0  ;;  %v435_v4 = vld [vmem:[%s543_s1 + $0x18] sm:$0xff]   ;;  %v436_v5 = vld [vmem:[%s542_s0] sm:$0xff]   ;;  %vm165_vm1 = vcmask 523264   ;;  %s464_s6 = smov [#allocation2]  }
   0x9   :  { %404 = vmatprep.mubr.msk.bf16.mxu1 %vm165_vm1, %v436_v5  ;;  %v437_v18 = vld [vmem:[%s542_s0 + $0x8] sm:$0xff]   ;;  %v438_v19 = vld [vmem:[%s542_s0 + $0x10] sm:$0xff]   ;;  %v439_v20 = vld [vmem:[%s542_s0 + $0x18] sm:$0xff]   ;;  %s332_s7 = sshll.u32 %s464_s6, 4  ;;  %s333_s7 = int_to_ptr.vmem [resolvable:$true] %s332_s7 }
   0xa   :  { %v360_v33 = vld [vmem:[%s545_s3] ss:$0 sm:$0xff]  ;;  %s440_s3 = scalar_lea.vmem %s333_s7, 1024  ;;  %p445_p1 = scmp.lt.s32.totalorder %s333_s7, %s333_s7 }
   0xb   :  { %p441_p0 = scmp.ne.s32.totalorder %s333_s7, %s440_s3  ;;  %p446_p2 = scmp.lt.s32.totalorder %s440_s3, %s440_s3 }
   0xd   :  { %p447_p3 = por %p446_p2, %p445_p1 }
   0xe   :  { %393 = vmatmul.mubr.msk.bf16.gmra.mrb[4].mxu0 %vm63_vm0, %v435_v4 }
   0xf   :  { %420 = vmatprep.mubr.msk.bf16.mxu0 %vm165_vm1, %v436_v5  ;;  %p448_p4 = pnand %p447_p3, %p441_p0 }
  0xd9   :  { %v390_v6 = vpop.f32.mrb[0].mxu0 }
  0xda   :  { %v110_v7 = vpop.f32.mrb[1].mxu0 }
  0xdb   :  { %v391_v8 = vpop.f32.mrb[2].mxu0 }
  0xdc   :  { %v142_v9 = vpack.c.bf16 %v391_v8, %v390_v6  ;;  %v113_v10 = vpop.f32.mrb[3].mxu0 }
  0xdd   :  { %v141_v11 = vpack.c.bf16 %v113_v10, %v110_v7 }
  0xdf   :  { %396 = vmatprep.subr.bf16.mxu1 %v141_v11 }
  0xe0   :  { %397 = vmatpush3.bf16.msra.mxu1 %v141_v11 }
  0xe1   :  { %v394_v12 = vpop.f32.mrb[4].mxu0  ;;  %398 = vmatprep.subr.bf16.mxu1 %v142_v9 }
  0xe2   :  { %v126_v13 = vpop.f32.mrb[5].mxu0 }
  0xe3   :  { %v395_v14 = vpop.f32.mrb[6].mxu0 }
  0xe4   :  { %v144_v15 = vpack.c.bf16 %v395_v14, %v394_v12  ;;  %v129_v16 = vpop.f32.mrb[7].mxu0  ;;  %399 = vmatpush3.bf16.msra.mxu1 %v142_v9 }
  0xe5   :  { %v143_v17 = vpack.c.bf16 %v129_v16, %v126_v13 }
  0xe7   :  { %400 = vmatprep.subr.bf16.mxu1 %v143_v17 }
  0xe8   :  { %401 = vmatpush3.bf16.msra.mxu1 %v143_v17 }
  0xe9   :  { %402 = vmatprep.subr.bf16.mxu1 %v144_v15 }
  0xec   :  { %403 = vmatpush3.bf16.msra.mxu1 %v144_v15 }
  0xef   :  { %405 = vmatmul.mubr.msk.bf16.vlgmr.msra.gmra.mrb[0].mxu1 %vm165_vm1, %v437_v18 }
  0xf0   :  { %408 = vmatprep.mubr.msk.bf16.mxu1 %vm165_vm1, %v438_v19 }
  0xf7   :  { %409 = vmatmul.mubr.msk.bf16.gmra.mrb[4].mxu1 %vm165_vm1, %v439_v20 }
 0x1c2   :  { %v406_v21 = vpop.f32.mrb[0].mxu1 }
 0x1c3   :  { %v212_v22 = vpop.f32.mrb[1].mxu1 }
 0x1c4   :  { %v407_v23 = vpop.f32.mrb[2].mxu1 }
 0x1c5   :  { %v244_v24 = vpack.c.bf16 %v407_v23, %v406_v21  ;;  %v215_v25 = vpop.f32.mrb[3].mxu1 }
 0x1c6   :  { %v243_v26 = vpack.c.bf16 %v215_v25, %v212_v22 }
 0x1c8   :  { %412 = vmatprep.subr.bf16.mxu0 %v243_v26 }
 0x1c9   :  { %413 = vmatpush3.bf16.msra.mxu0 %v243_v26 }
 0x1ca   :  { %v410_v27 = vpop.f32.mrb[4].mxu1  ;;  %414 = vmatprep.subr.bf16.mxu0 %v244_v24 }
 0x1cb   :  { %v228_v28 = vpop.f32.mrb[5].mxu1 }
 0x1cc   :  { %v411_v29 = vpop.f32.mrb[6].mxu1 }
 0x1cd   :  { %v246_v30 = vpack.c.bf16 %v411_v29, %v410_v27  ;;  %v231_v31 = vpop.f32.mrb[7].mxu1  ;;  %415 = vmatpush3.bf16.msra.mxu0 %v244_v24 }
 0x1ce   :  { %v245_v32 = vpack.c.bf16 %v231_v31, %v228_v28 }
 0x1d0   :  { %416 = vmatprep.subr.bf16.mxu0 %v245_v32 }
 0x1d1   :  { %417 = vmatpush3.bf16.msra.mxu0 %v245_v32 }
 0x1d2   :  { %418 = vmatprep.subr.bf16.mxu0 %v246_v30 }
 0x1d5   :  { %419 = vmatpush3.bf16.msra.mxu0 %v246_v30 }
 0x1d8   :  { %421 = vmatmul.mubr.msk.bf16.vlgmr.msra.gmra.mrb[8].mxu0 %vm165_vm1, %v437_v18 }
 0x1d9   :  { %424 = vmatprep.mubr.msk.bf16.mxu0 %vm165_vm1, %v438_v19 }
 0x1e0   :  { %425 = vmatmul.mubr.msk.bf16.gmra.mrb[12].mxu0 %vm165_vm1, %v439_v20 }
 0x2ab   :  { %v422_v34 = vpop.f32.mrb[8].mxu0 }
 0x2ac   :  { %v297_v35 = vadd.f32 %v422_v34, %v360_v33  ;;  %v288_v36 = vpop.f32.mrb[9].mxu0 }
 0x2ad   :  { %v289_v37 = vadd.f32 %v360_v33, %v288_v36  ;;  %v423_v38 = vpop.f32.mrb[10].mxu0 }
 0x2ae   :  { %321 = vst [vmem:[#allocation2 + $0x10] sm:$0xff] %v297_v35  ;;  %v300_v39 = vadd.f32 %v423_v38, %v360_v33  ;;  %v291_v40 = vpop.f32.mrb[11].mxu0 }
 0x2af   :  { %319 = vst [vmem:[#allocation2] sm:$0xff] %v289_v37  ;;  %v292_v41 = vadd.f32 %v360_v33, %v291_v40 }
 0x2b0   :  { %322 = vst [vmem:[#allocation2 + $0x18] sm:$0xff] %v300_v39 }
 0x2b1   :  { %320 = vst [vmem:[#allocation2 + $0x8] sm:$0xff] %v292_v41 }
 0x2b3   :  { %v426_v42 = vpop.f32.mrb[12].mxu0 }
 0x2b4   :  { %v313_v43 = vadd.f32 %v426_v42, %v360_v33  ;;  %v304_v44 = vpop.f32.mrb[13].mxu0 }
 0x2b5   :  { %v305_v45 = vadd.f32 %v360_v33, %v304_v44  ;;  %v427_v46 = vpop.f32.mrb[14].mxu0 }
 0x2b6   :  { %325 = vst [vmem:[#allocation2 + $0x30] sm:$0xff] %v313_v43  ;;  %v316_v47 = vadd.f32 %v427_v46, %v360_v33  ;;  %v307_v48 = vpop.f32.mrb[15].mxu0 }
 0x2b7   :  { %323 = vst [vmem:[#allocation2 + $0x20] sm:$0xff] %v305_v45  ;;  %v308_v49 = vadd.f32 %v360_v33, %v307_v48 }
 0x2b8   :  { %326 = vst [vmem:[#allocation2 + $0x38] sm:$0xff] %v316_v47 }
 0x2b9   :  { %324 = vst [vmem:[#allocation2 + $0x28] sm:$0xff] %v308_v49 }
 0x2ba   :  { %451 = shalt.err (!%p448_p4)
}
 0x2bb   :  { %s452_s10 = scalar_lea.hbm %s546_s4, 1024 }
 0x2bc   :  { %p453_p5 = scmp.ne.s32.totalorder %s546_s4, %s452_s10  ;;  %p456_p6 = scmp.lt.u32.totalorder %s452_s10, %s546_s4 }
 0x2be   :  { %p458_p7 = pnand %p456_p6, %p453_p5 }
 0x2c0   :  { %461 = shalt.err (!%p458_p7)
}
 0x2c1   :  { %s465_s15 = smov 128   ;;  %s466_s16 = smov 8  }
 0x2c2   :  { %338 = dma.vmem_to_hbm [thread:$0]  %s333_s7, 1024, %s546_s4, [#allocation3], %s465_s15, %s465_s15, %s466_s16  }
 0x2c3   :  { %462 = dma.done.wait [#allocation3], 1024  }
 0x2c4   :  { %463 = vsyncadd [#allocation3], 4294966272 }
 0x2c5   :  { %342 = vsyncpa [#allocation3], 1 }

</bundles_post_ra>
